<compile_context>
chip_gen: v5e
topology: v5e:2x2
jax: 0.10.0
libtpu: 0.0.40
codegen_flags: <defaults>
</compile_context>

<pallas_src>
import jax
import jax.numpy as jnp
from jax.experimental import pallas as pl
from jax.experimental.pallas import tpu as pltpu


# ---------------------------------------------------------------------------
# Tiling for the extended-mask kernel (the only HBM-heavy op).
#   - Output tiles are grown to up to 512 x 8192 = 4 MiB of bool/int8 so the
#     ~0.35 us per-grid-step overhead amortizes to <20% of the HBM-write time.
#   - Double-buffered worst case is ~8 MiB of VMEM; the explicit 32 MiB
#     scoped-VMEM limit below keeps this safe on v5e (16 MiB default) as well
#     as v6e/v7x.
#   - Row tiles are 32-aligned (int8/bool sublane packing), col tiles are
#     128-aligned (lane-dense, unmasked vector stores).
# ---------------------------------------------------------------------------
_TILE_I_TARGET = 512
_TILE_J_TARGET = 8192
_VMEM_LIMIT_BYTES = 32 * 1024 * 1024


def _round_up(x: int, m: int) -> int:
    return ((x + m - 1) // m) * m


def _pick_tile(dim: int, target: int, align: int) -> int:
    """Full extent if it fits the target, else the largest aligned tile <= target."""
    if dim <= target:
        return dim                                   # full extent: always legal
    return max(align, (target // align) * align)


def _choose_tiles(B: int, sub: int, S_full: int):
    ti = _pick_tile(sub, _TILE_I_TARGET, 32)
    tj = _pick_tile(S_full, _TILE_J_TARGET, 128)

    def steps(a, b):
        return B * pl.cdiv(sub, a) * pl.cdiv(S_full, b)

    # v7x megacore / pipelining: keep >= 4 total grid steps whenever the
    # problem is splittable, so both TensorCores get work and the output DMA
    # double-buffers.  Harmless no-op on single-TC v5e/v6e and tiny problems.
    while steps(ti, tj) < 4:
        if tj >= 256:
            tj = _round_up(tj // 2, 128)
        elif ti >= 64:
            ti = _round_up(ti // 2, 32)
        else:
            break
    return ti, tj


# ---------------------------------------------------------------------------
# Kernels.
#   rows_ref: (1, tile_i, 1)   local sub-sequence rows (column-oriented)
#   cols_ref: (1, 1, tile_j)   full-sequence columns  (row-oriented)
#   out_ref : (1, tile_i, tile_j)  bool (or int8 fallback)
# ---------------------------------------------------------------------------
def _ext_mask_kernel_generic(rows_ref, cols_ref, out_ref):
    # Exact reference semantics for arbitrary mask values: (r * c) < 0.5 in f32.
    r = rows_ref[0, :, :].astype(jnp.float32)        # (tile_i, 1)
    c = cols_ref[0, :, :].astype(jnp.float32)        # (1, tile_j)
    out_ref[0, :, :] = ((r * c) < 0.5).astype(out_ref.dtype)


def _ext_mask_kernel_binary(rows_ref, cols_ref, out_ref):
    # Specialization for binary / non-negative-integer masks:
    #   (r * c) < 0.5  <=>  (r == 0) | (c == 0)
    # This replaces the per-element f32 multiply+compare+pack chain with a
    # single broadcast OR, keeping the kernel HBM-write-bound on v7x.
    r_off = rows_ref[0, :, :] == 0                   # (tile_i, 1) bool
    c_off = cols_ref[0, :, :] == 0                   # (1, tile_j) bool
    out_ref[0, :, :] = (r_off | c_off).astype(out_ref.dtype)


def _ext_mask_call(rows_col, cols_row, out_dtype, tile_i, tile_j, binary):
    kernel = _ext_mask_kernel_binary if binary else _ext_mask_kernel_generic
    B, sub, _ = rows_col.shape
    _, _, S_full = cols_row.shape
    gi = pl.cdiv(sub, tile_i)
    gj = pl.cdiv(S_full, tile_j)

    out_bytes = B * sub * S_full * jnp.dtype(out_dtype).itemsize
    in_bytes = (rows_col.size * rows_col.dtype.itemsize
                + cols_row.size * cols_row.dtype.itemsize)

    return pl.pallas_call(
        kernel,
        out_shape=jax.ShapeDtypeStruct((B, sub, S_full), out_dtype),
        grid=(B, gi, gj),
        in_specs=[
            pl.BlockSpec((1, tile_i, 1), lambda b, i, j: (b, i, 0)),
            pl.BlockSpec((1, 1, tile_j), lambda b, i, j: (b, 0, j)),
        ],
        out_specs=pl.BlockSpec((1, tile_i, tile_j), lambda b, i, j: (b, i, j)),
        compiler_params=pltpu.CompilerParams(
            # Every tile is independent: all axes parallel (lets v7x shard the
            # grid across both TensorCores; harmless on v5e/v6e).
            dimension_semantics=("parallel", "parallel", "parallel"),
            vmem_limit_bytes=_VMEM_LIMIT_BYTES),
        cost_estimate=pl.CostEstimate(
            flops=B * sub * S_full,
            transcendentals=0,
            bytes_accessed=out_bytes + in_bytes),
    )(rows_col, cols_row)


# ---------------------------------------------------------------------------
# One-time, eager probe for bool-output lowering support.  This runs a real
# AOT compile (outside any user jit trace), so the decision is made once and
# the actual kernel calls are never wrapped in a try/except that jit could
# bypass.
# ---------------------------------------------------------------------------
_BOOL_OUT_OK = None


def _bool_output_supported() -> bool:
    global _BOOL_OUT_OK
    if _BOOL_OUT_OK is None:
        try:
            r = jnp.ones((1, 8, 1), jnp.int8)
            c = jnp.ones((1, 1, 128), jnp.int8)
            probe = jax.jit(
                lambda a, b: _ext_mask_call(a, b, jnp.bool_, 8, 128, True))
            probe.lower(r, c).compile()
            _BOOL_OUT_OK = True
        except Exception:
            _BOOL_OUT_OK = False
    return _BOOL_OUT_OK


class PreProcessor:
    """JAX/Pallas port of the PyTorch PreProcessor module."""

    def __init__(self, sub_seq_length: int, local_rank: int = 0,
                 assume_binary_mask: bool = False):
        self.sub_seq_length = int(sub_seq_length)
        self.local_rank = int(local_rank)
        # If True, the caller asserts the attention mask only contains {0, 1}
        # (the normal BERT case) and the cheaper OR-based kernel is used even
        # for float/signed-int masks.  bool / unsigned-int masks always use it
        # (exact in those cases).
        self.assume_binary_mask = bool(assume_binary_mask)

    # -- bert_extended_attention_mask --------------------------------------
    def bert_extended_attention_mask(self, attention_mask: jax.Array) -> jax.Array:
        B, S_full = attention_mask.shape
        sub = self.sub_seq_length
        start = self.local_rank * sub

        am = attention_mask
        binary = (self.assume_binary_mask
                  or am.dtype == jnp.bool_
                  or jnp.issubdtype(am.dtype, jnp.unsignedinteger))
        if am.dtype == jnp.bool_:
            # Tiny [B, S_full] cast; avoids bool-input lowering corner cases.
            am = am.astype(jnp.int8)

        # Pre-select the local rows once (tiny [B, S_full]-sized op) and present
        # both operands in the orientation the kernel consumes, so the BlockSpec
        # DMAs do all layout work and the kernel needs no in-VMEM transpose.
        rows_col = jax.lax.slice_in_dim(
            am, start, start + sub, axis=1)[:, :, None]   # [B, sub, 1]
        cols_row = am[:, None, :]                          # [B, 1, S_full]

        tile_i, tile_j = _choose_tiles(B, sub, S_full)

        if _bool_output_supported():
            # Write the bool result directly: single HBM pass over the output.
            ext = _ext_mask_call(rows_col, cols_row, jnp.bool_,
                                 tile_i, tile_j, binary)
        else:
            # TODO(synk): fallback costs one extra elementwise pass (int8 -> bool);
            # only taken on builds where bool pallas outputs fail to lower.
            ext = _ext_mask_call(rows_col, cols_row, jnp.int8,
                                 tile_i, tile_j, binary) != 0

        # Free metadata reshape to add the singleton head axis.
        return ext[:, None, :, :]

    # -- bert_position_ids ---------------------------------------------------
    def bert_position_ids(self, token_ids: jax.Array) -> jax.Array:
        # Plain XLA: a tiny data-independent iota is fused for free; a
        # pallas_call here would be pure dispatch overhead.
        # NOTE: int32 (vs torch int64); fine for any realistic sequence length.
        B, S_local = token_ids.shape
        start = jnp.int32(S_local * self.local_rank)
        return start + jax.lax.broadcasted_iota(jnp.int32, (B, S_local), 1)

    # -- forward ---------------------------------------------------------------
    def __call__(self, input_ids=None, attention_mask=None):
        extended_attention_mask = (
            self.bert_extended_attention_mask(attention_mask)
            if attention_mask is not None else None)
        position_ids = (
            self.bert_position_ids(input_ids) if input_ids is not None else None)
        return position_ids, extended_attention_mask


# ---------------------------------------------------------------------------
# Reference (pure JAX) for correctness checks.
# ---------------------------------------------------------------------------
def _reference(input_ids, attention_mask, sub_seq_length, local_rank):
    B, S_local = input_ids.shape
    pos = jnp.arange(S_local * local_rank, S_local * (local_rank + 1),
                     dtype=jnp.int32)
    pos = jnp.broadcast_to(pos[None, :], input_ids.shape)

    start = local_rank * sub_seq_length
    end = (local_rank + 1) * sub_seq_length
    am = attention_mask.astype(jnp.float32)
    bss = (am[:, :, None] * am[:, None, :])[:, start:end, :]
    ext = bss[:, None, :, :] < 0.5
    return pos, ext


if __name__ == "__main__":
    key = jax.random.PRNGKey(0)
    k1, k2, k3, k4 = jax.random.split(key, 4)

    # ---- small-shape check (world size 2, this shard is local rank 1) ----
    B, sub, world, local_rank = 2, 8, 2, 1
    S_full = sub * world

    input_ids = jax.random.randint(k1, (B, sub), 0, 1000, dtype=jnp.int32)
    attention_mask = (jax.random.uniform(k2, (B, S_full)) > 0.3).astype(jnp.float32)

    pre = PreProcessor(sub_seq_length=sub, local_rank=local_rank)
    position_ids, extended_mask = pre(input_ids=input_ids,
                                      attention_mask=attention_mask)
    jax.block_until_ready(position_ids)
    jax.block_until_ready(extended_mask)

    ref_pos, ref_ext = _reference(input_ids, attention_mask, sub, local_rank)
    assert position_ids.shape == (B, sub) and position_ids.dtype == jnp.int32
    assert extended_mask.shape == (B, 1, sub, S_full)
    assert extended_mask.dtype == jnp.bool_
    assert bool(jnp.all(position_ids == ref_pos))
    assert bool(jnp.all(extended_mask == ref_ext))

    # bool mask -> binary (OR) fast path, exact
    _, ext_bool = pre(attention_mask=attention_mask.astype(jnp.bool_))
    jax.block_until_ready(ext_bool)
    assert bool(jnp.all(ext_bool == ref_ext))

    # float {0,1} mask with assume_binary_mask=True -> binary fast path
    pre_b = PreProcessor(sub_seq_length=sub, local_rank=local_rank,
                         assume_binary_mask=True)
    _, ext_flag = pre_b(attention_mask=attention_mask)
    jax.block_until_ready(ext_flag)
    assert bool(jnp.all(ext_flag == ref_ext))

    # local rank 0 as well (generic path)
    pre0 = PreProcessor(sub_seq_length=sub, local_rank=0)
    pos0, ext0 = pre0(input_ids=input_ids, attention_mask=attention_mask)
    ref_pos0, ref_ext0 = _reference(input_ids, attention_mask, sub, 0)
    assert bool(jnp.all(pos0 == ref_pos0)) and bool(jnp.all(ext0 == ref_ext0))

    # ---- moderately sized check: exercises the multi-block (tiled) grid ----
    B2, sub2, world2, rank2 = 2, 512, 2, 1
    S2 = sub2 * world2
    ids2 = jax.random.randint(k3, (B2, sub2), 0, 1000, dtype=jnp.int32)
    mask2 = (jax.random.uniform(k2, (B2, S2)) > 0.5).astype(jnp.float32)
    pre2 = PreProcessor(sub_seq_length=sub2, local_rank=rank2)
    pos2, ext2 = pre2(input_ids=ids2, attention_mask=mask2)
    jax.block_until_ready(ext2)
    rpos2, rext2 = _reference(ids2, mask2, sub2, rank2)
    assert bool(jnp.all(pos2 == rpos2)) and bool(jnp.all(ext2 == rext2))

    # ---- ragged / cdiv-grid check: blocks that do NOT divide the array ----
    m3 = (jax.random.uniform(k4, (1, 200)) > 0.4).astype(jnp.float32)
    rows3 = m3[:, 0:40][:, :, None]                 # [1, 40, 1]
    cols3 = m3[:, None, :]                          # [1, 1, 200]
    out3 = _ext_mask_call(rows3, cols3, jnp.int8, 32, 128, binary=False)
    jax.block_until_ready(out3)
    ref3 = ((m3[:, :, None] * m3[:, None, :])[:, 0:40, :] < 0.5)
    assert out3.shape == (1, 40, 200)
    assert bool(jnp.all((out3 != 0) == ref3))

    print("KERNEL_OK")
</pallas_src>

<mosaic_0001>
module attributes {stable_mosaic.version = 11 : i64} {
  func.func @_ext_mask_kernel_generic(%arg0: i32, %arg1: i32, %arg2: i32, %arg3: memref<1x8x1xf32, #tpu.memory_space<vmem>>, %arg4: memref<1x1x16xf32, #tpu.memory_space<vmem>>, %arg5: memref<1x8x16xi8, #tpu.memory_space<vmem>>) attributes {dimension_semantics = [#tpu.dimension_semantics<parallel>, #tpu.dimension_semantics<parallel>, #tpu.dimension_semantics<parallel>], iteration_bounds = array<i64: 2, 1, 1>, scalar_prefetch = 0 : i64, scratch_operands = 0 : i64, tpu.core_type = #tpu.core_type<tc>, window_params = [{transform_indices = @transform_0, window_bounds = array<i64: 1, 8, 1>}, {transform_indices = @transform_1, window_bounds = array<i64: 1, 1, 16>}, {transform_indices = @transform_2, window_bounds = array<i64: 1, 8, 16>}]} {
    %c0 = arith.constant 0 : index
    %c0_0 = arith.constant 0 : index
    %c0_1 = arith.constant 0 : index
    %0 = vector.load %arg3[%c0, %c0_0, %c0_1] : memref<1x8x1xf32, #tpu.memory_space<vmem>>, vector<1x8x1xf32>
    %1 = vector.shape_cast %0 : vector<1x8x1xf32> to vector<8x1xf32>
    %c0_2 = arith.constant 0 : index
    %c0_3 = arith.constant 0 : index
    %c0_4 = arith.constant 0 : index
    %2 = vector.load %arg4[%c0_2, %c0_3, %c0_4] : memref<1x1x16xf32, #tpu.memory_space<vmem>>, vector<1x1x16xf32>
    %3 = vector.shape_cast %2 : vector<1x1x16xf32> to vector<1x16xf32>
    %4 = vector.broadcast %1 : vector<8x1xf32> to vector<8x16xf32>
    %5 = vector.broadcast %3 : vector<1x16xf32> to vector<8x16xf32>
    %6 = arith.mulf %4, %5 : vector<8x16xf32>
    %cst = arith.constant 5.000000e-01 : f32
    %7 = vector.broadcast %cst : f32 to vector<8x16xf32>
    %8 = arith.cmpf olt, %6, %7 : vector<8x16xf32>
    %9 = arith.extui %8 : vector<8x16xi1> to vector<8x16xi8>
    %c0_5 = arith.constant 0 : index
    %c0_6 = arith.constant 0 : index
    %c0_7 = arith.constant 0 : index
    %10 = vector.load %arg5[%c0_5, %c0_6, %c0_7] : memref<1x8x16xi8, #tpu.memory_space<vmem>>, vector<1x8x16xi8>
    %11 = vector.shape_cast %10 : vector<1x8x16xi8> to vector<8x16xi8>
    %12 = vector.shape_cast %9 : vector<8x16xi8> to vector<1x8x16xi8>
    tpu.vector_store %arg5[%c0_5, %c0_6, %c0_7], %12 {strides = array<i32>} : memref<1x8x16xi8, #tpu.memory_space<vmem>>, vector<1x8x16xi8>,
    return
  }
  func.func @transform_0(%arg0: i32, %arg1: i32, %arg2: i32) -> (i32, i32, i32) {
    %c0_i32 = arith.constant 0 : i32
    %c0_i32_0 = arith.constant 0 : i32
    return %arg0, %arg1, %c0_i32 : i32, i32, i32
  }
  func.func @transform_1(%arg0: i32, %arg1: i32, %arg2: i32) -> (i32, i32, i32) {
    %c0_i32 = arith.constant 0 : i32
    %c0_i32_0 = arith.constant 0 : i32
    return %arg0, %c0_i32, %arg2 : i32, i32, i32
  }
  func.func @transform_2(%arg0: i32, %arg1: i32, %arg2: i32) -> (i32, i32, i32) {
    %c0_i32 = arith.constant 0 : i32
    return %arg0, %arg1, %arg2 : i32, i32, i32
  }
}

</mosaic_0001>

<bundles_post_ra>
// kernel: tpu_custom_call.1
= control target key start
LH: loop header
LB: loop body
LE: loop exit
PB: predicated region body
PF: predicated region fallthrough
CT: control target
= control target key end

     0   :  { %7 = vsyncpa [#allocation3], 0  ;;  %s590_s0 = inlined_call_operand.vmem [shape: f32[2,8,1], index: 0, kind: input, shape index: {}]   ;;  %s591_s1 = inlined_call_operand.vmem [shape: f32[2,1,16], index: 1, kind: input, shape index: {}]   ;;  %s592_s2 = inlined_call_operand.hbm [shape: s8[2,8,16], index: 2, kind: output, shape index: {}]  }
   0x1   :  { %9 = vsyncpa [#allocation3 + $0x1], 0  ;;  %s490_s9 = smov 0   ;;  %s492_s10 = smov 0  }
   0x2   :  { %s494_s11 = smov 0   ;;  %s496_s12 = smov 0  }
   0x3   :  { %s498_s13 = smov 0   ;;  %s500_s14 = smov 0  }
   0x4 LB: > { %s325_s15 = sadd.s32 4294967295, %s472_s14   ;;  %s326_s16 = sadd.s32 4294967294, %s472_s14   ;;  %s472_s14 = sphi %s500_s14, %s15_s14   ;;  %s468_s13 = sphi %s498_s13, %s599_s13   ;;  %s464_s12 = sphi %s496_s12, %s598_s12   ;;  %s460_s11 = sphi %s494_s11, %s597_s11   ;;  %s456_s10 = sphi %s492_s10, %s596_s10   ;;  %s452_s9 = sphi %s490_s9, %s595_s9  }
   0x5   : > { %s34_s17 = sadd.s32 1, %s468_s13  ;;  %s101_s18 = sadd.s32 1, %s460_s11 }
   0x6   : > { %p36_p0 = scmp.ge.s32.totalorder %s34_s17, 2  ;;  %p111_p1 = scmp.ne.s32.totalorder %s460_s11, %s456_s10 }
   0x7   : > { %p112_p2 = scmp.eq.s32.totalorder %s325_s15, 1  ;;  %p117_p3 = scmp.ne.s32.totalorder %s456_s10, %s452_s9 }
   0x8   : > { %s601_s17 = smov (%p36_p0, %s34_s17), 0  ;;  %p118_p5 = scmp.eq.s32.totalorder %s326_s16, 1 }
   0x9   : > { %p530_p4 = por %p112_p2, %p111_p1  ;;  %s94_s20 = ssub.s32 %s468_s13, %s601_s17 }
   0xa   : > { %p329_p6 = scmp.ge.s32.totalorder %s472_s14, 1  ;;  %p99_p7 = scmp.eq.s32.totalorder %s94_s20, 0 }
   0xb   : > { %p537_p8 = por %p118_p5, %p117_p3  ;;  %p155_p9 = scmp.lt.s32.totalorder %s472_s14, 3 }
   0xc   : > { %s543_s22 = scalar_select %p99_p7, %s460_s11, %s101_s18  }
   0xd   : > { %p156_p10 = pnand %p329_p6, %p155_p9 }
   0xe   : > { %p185_p11 = scmp.lt.s32.totalorder (!%p156_p10), %s464_s12, 1  ;;  %s182_s3 = sand.u32 (!%p156_p10), 1, %s456_s10  }
   0xf   : > { %159 = sbr.rel (%p156_p10) target bundleno = 152 (0x98), region = 28  ;;  %s330_s4 = sshll.u32 (!%p156_p10), %s182_s3, 1 }
  0x10   : > { %s333_s5 = sshll.u32 (!%p156_p10), %s464_s12, 1  ;;  %s184_s15 = scalar_lea.vmem (!%p156_p10), [#allocation2], %s330_s4 }
  0x11   : > { %s233_s8 = scalar_lea.hbm (!%p156_p10), %s592_s2, %s333_s5  ;;  %s235_s16 = sshll.u32 (!%p156_p10), %s184_s15, 4  ;;  %s236_s16 = int_to_ptr.vmem [resolvable:$true] %s235_s16 }
  0x12   : > { %s237_s18 = sshll.u32 (!%p156_p10), %s233_s8, 4  ;;  %s414_s26 = scalar_lea.hbm (!%p156_p10), %s592_s2, 4  ;;  %s238_s18 = int_to_ptr.hbm [resolvable:$true] %s237_s18 }
  0x13   : > { %s408_s20 = sshra.s32 (!%p156_p10), %s238_s18, 4  ;;  %s409_s20 = int_to_ptr.hbm [resolvable:$true] %s408_s20 }
  0x14   : > { %v474_v0 = vmov 0   ;;  %s186_s23 = scalar_select %p185_p11, %s464_s12, 1  ;;  %vm218_vm2 = vcmask 123904  }
  0x15   : > { %392 = vset.pattern.permute.xlu0 %v474_v0  ;;  %s221_s12 = scalar_lea.sflag [#allocation3], %s182_s3  ;;  %p415_p1 = scmp.lt.s32.totalorder %s409_s20, %s592_s2 }
  0x16   : > { %s331_s24 = sshll.u32 %s186_s23, 3  ;;  %s197_s27 = scalar_lea.vmem %s591_s1, %s186_s23 }
  0x17   : > { %s191_s30 = scalar_lea.vmem %s590_s0, %s331_s24  ;;  %v393_v2 = vld [vmem:[%s197_s27] ss:$0 sm:$0xff]  ;;  %s410_s23 = scalar_lea.hbm %s409_s20, 2 }
  0x18   : > { %v200_v1 = vld [vmem:[%s191_s30] sm:$0xff]  ;;  %p411_p12 = scmp.ne.s32.totalorder %s409_s20, %s410_s23  ;;  %p416_p2 = scmp.lt.s32.totalorder %s414_s26, %s410_s23 }
  0x19   : > { %204 = vperm.xlu0 %392, %v200_v1  }
  0x1a   : > { %p412_p13 = pnand %p411_p12, %p530_p4  ;;  %p417_p3 = por %p416_p2, %p415_p1 }
  0x1c   : > { %p413_p0 = pneg %p412_p13 }
  0x1e   : > { %p418_p5 = pnand %p417_p3, %p413_p0 }
  0x8b   : > { %v205_v3 = vpop.permute.xlu0 %204 }
  0x8c   : > { %v210_v4 = vmul.f32 %v393_v2, %v205_v3 }
  0x8e   : > { %vm211_vm0 = vcmp.lt.f32.partialorder %v210_v4, 0.5 }
  0x8f   : > { %vm212_vm1 = vmpackc.low %vm211_vm0, %vm211_vm0 }
  0x90   : > { %v213_v5 = vsel %vm212_vm1, 16711935, %v474_v0 }
  0x91   : > { %v215_v6 = vpack.c.b8 %v213_v5, %v213_v5 }
  0x93   : > { %vm216_vm3 = vnez %v215_v6 }
  0x94   : > { %v217_v7 = vsel %vm216_vm3, 16843009, %v474_v0 }
  0x95   : > { %219 = vst.msk [vmem:[%s184_s15] sm:$0x3] %vm218_vm2, %v217_v7 }
  0x96   : > { %421 = shalt.err (!%p418_p5)
}
  0x97   : > { %336 = dma.vmem_to_hbm [thread:$0]  (%p530_p4), %s236_s16, 32, %s238_s18, %s221_s12  }
  0x98 PF: > { %p342_p6 = scmp.ge.s32.totalorder %s472_s14, 2  ;;  %s249_s29 = sand.u32 1, %s452_s9  }
  0x99   : > { %s250_s30 = scalar_lea.sflag [#allocation3], %s249_s29 }
  0x9a   : > { %p339_p7 = pnand %p342_p6, %p537_p8 }
  0x9c   : > { %p340_p9 = pneg %p339_p7 }
  0x9e   : > { %447 = dma.done.wait (%p340_p9), %s250_s30, 32  }
  0x9f   : > { %449 = vsyncadd (%p340_p9), %s250_s30, 4294967264  ;;  %s15_s14 = sadd.s32 1, %s472_s14   ;;  %s595_s9 = smov %s456_s10 }
  0xa0   : > { %p12_p10 = scmp.ge.s32.totalorder %s15_s14, 4   ;;  %s596_s10 = smov %s460_s11 }
  0xa1   : > { %s597_s11 = smov %s543_s22  ;;  %s598_s12 = smov %s468_s13 }
  0xa2   : > { %s599_s13 = smov %s601_s17  ;;  %14 = sbr.rel (!%p12_p10) target bundleno = 4 (0x4), region = 66 }
  0xa7   :  { %256 = vsyncpa [#allocation3], 1 }
  0xa8   :  { %258 = vsyncpa [#allocation3 + $0x1], 1 }

</bundles_post_ra>
